<compile_context>
chip_gen: v7x
topology: tpu7x:2x2x1
jax: 0.10.0
libtpu: 0.0.40
codegen_flags: <defaults>
</compile_context>

<pallas_src>
import functools

import jax
import jax.numpy as jnp
from jax.experimental import pallas as pl
from jax.experimental.pallas import tpu as pltpu

# ---- synthetic cfg matching the module's __init__ keys -----------------------
CFG = dict(
    window_size=4,        # Conv1d in_channels
    model_hidden=32,      # self.dim
    model_nblocks=2,
    model_dropout=0.1,
)
KSIZE, STRIDE, PAD = 3, 1, 1      # _conv_block Conv1d hyperparams
POOL_K, POOL_S = 3, 2             # _conv_block MaxPool1d hyperparams
BN_EPS = 1e-5


# ---------------------------- Pallas kernels ----------------------------------
def _conv_block_kernel(w_ref, b_ref, x_ref, o_ref):
    # w_ref : (KSIZE, C_in, dim)  conv weights, tap-major, (in, out) per tap
    # b_ref : (1, dim)            conv bias (lane-dense)
    # x_ref : (1, Lp, C_in)       zero-padded input for this batch element
    # o_ref : (1, L_out, dim)     ReLU+MaxPool output, (length, feature) orientation
    x = x_ref[0]                                        # (Lp, C_in)
    lp = x.shape[0]
    l_conv = (lp - KSIZE) // STRIDE + 1
    l_out = o_ref.shape[1]

    # Conv1d as KSIZE shifted dots (contiguous static sublane slices of x).
    acc = jnp.dot(x[0:l_conv, :], w_ref[0], preferred_element_type=jnp.float32)
    for k in range(1, KSIZE):
        acc += jnp.dot(x[k:k + l_conv, :], w_ref[k],
                       preferred_element_type=jnp.float32)
    relu = jnp.maximum(acc + b_ref[...], 0.0)           # (L_conv, dim)

    # MaxPool1d(kernel=POOL_K, stride=POOL_S): VPU max over static sublane windows.
    pooled = jnp.concatenate(
        [jnp.max(relu[POOL_S * j:POOL_S * j + POOL_K, :], axis=0, keepdims=True)
         for j in range(l_out)],
        axis=0)                                         # (L_out, dim)
    o_ref[0] = pooled


def _mlp_kernel(nblocks, x_ref, w_ref, s_ref, o_ref):
    # x_ref : (tm, dim)             row tile of the MLP input
    # w_ref : (nblocks, dim, dim)   Linear weights (in, out) with BN scale folded in
    # s_ref : (nblocks, 1, dim)     folded Linear-bias + eval-mode BatchNorm1d shift
    h = x_ref[...]
    for i in range(nblocks):
        h = jnp.maximum(
            jnp.dot(h, w_ref[i], preferred_element_type=jnp.float32) + s_ref[i],
            0.0)                      # Linear + BN (folded) + ReLU; Dropout = identity
    o_ref[...] = h


# ------------------------------ wrappers --------------------------------------
def conv_block(x, w_conv, b_conv):
    """x: (B, C_in, L) NCL.  Returns conv-block output as (B, L_out, dim) (length-major,
    lane-dense); the caller transposes to the PyTorch (B, dim, L_out) layout."""
    B, C_in, L = x.shape
    dim = w_conv.shape[0]
    Lp = L + 2 * PAD
    L_conv = (Lp - KSIZE) // STRIDE + 1
    L_out = (L_conv - POOL_K) // POOL_S + 1

    # Single padded copy of the input (no K-times-duplicated im2col buffer in HBM).
    xpt = jnp.transpose(jnp.pad(x, ((0, 0), (0, 0), (PAD, PAD))), (0, 2, 1))  # (B, Lp, C_in)
    wkt = jnp.transpose(w_conv, (2, 1, 0))                                    # (K, C_in, dim)
    b2 = b_conv.reshape(1, dim)                                               # lane-dense bias

    return pl.pallas_call(
        _conv_block_kernel,
        out_shape=jax.ShapeDtypeStruct((B, L_out, dim), jnp.float32),
        grid=(B,),
        in_specs=[
            pl.BlockSpec((KSIZE, C_in, dim), lambda b: (0, 0, 0)),   # weights VMEM-resident
            pl.BlockSpec((1, dim), lambda b: (0, 0)),
            pl.BlockSpec((1, Lp, C_in), lambda b: (b, 0, 0)),
        ],
        out_specs=pl.BlockSpec((1, L_out, dim), lambda b: (b, 0, 0)),
        compiler_params=pltpu.CompilerParams(dimension_semantics=("parallel",)),
    )(wkt, b2, xpt)


def mlp_head(h, w_eff, shift_eff):
    N, dim = h.shape
    nblocks = w_eff.shape[0]
    tm = N if N <= 128 else 128                 # row tile; whole thing at toy size
    kernel = functools.partial(_mlp_kernel, nblocks)
    return pl.pallas_call(
        kernel,
        out_shape=jax.ShapeDtypeStruct((N, dim), jnp.float32),
        grid=(pl.cdiv(N, tm),),
        in_specs=[
            pl.BlockSpec((tm, dim), lambda i: (i, 0)),
            pl.BlockSpec((nblocks, dim, dim), lambda i: (0, 0, 0)),  # weights VMEM-resident
            pl.BlockSpec((nblocks, 1, dim), lambda i: (0, 0, 0)),
        ],
        out_specs=pl.BlockSpec((tm, dim), lambda i: (i, 0)),
        compiler_params=pltpu.CompilerParams(dimension_semantics=("parallel",)),
    )(h, w_eff, shift_eff)


def cnn_forward(params, x):
    dim = params["w_blk"].shape[-1]
    conv_ld = conv_block(x, params["w_conv"], params["b_conv"])     # (B, L_out, dim)
    # PyTorch's conv-block output layout is (B, dim, L_out) and `x.view(-1, self.dim)`
    # is a raw row-major reinterpretation of it -> realized as a tiny XLA transpose
    # plus a free reshape between the two pallas_calls.
    h = jnp.transpose(conv_ld, (0, 2, 1)).reshape(-1, dim)
    # Fold eval-mode BatchNorm1d and the Linear bias into the Linear weights/shift.
    w_eff = params["w_blk"] * params["bn_scale"]                    # scales output cols
    shift_eff = params["b_blk"] * params["bn_scale"] + params["bn_shift"]
    return mlp_head(h, w_eff, shift_eff)


# --------------------------- deterministic params ------------------------------
def init_params(key):
    dim = CFG["model_hidden"]
    cin = CFG["window_size"]
    nb = CFG["model_nblocks"]
    ks = jax.random.split(key, 8)
    w_conv = 0.2 * jax.random.normal(ks[0], (dim, cin, KSIZE), jnp.float32)   # torch Conv1d layout
    b_conv = 0.1 * jax.random.normal(ks[1], (dim,), jnp.float32)
    # torch Linear weight is (out, in); stored here pre-transposed as (in, out)
    w_blk = jax.random.normal(ks[2], (nb, dim, dim), jnp.float32) / jnp.sqrt(dim)
    b_blk = 0.1 * jax.random.normal(ks[3], (nb, 1, dim), jnp.float32)
    gamma = 1.0 + 0.1 * jax.random.normal(ks[4], (nb, 1, dim), jnp.float32)
    beta = 0.1 * jax.random.normal(ks[5], (nb, 1, dim), jnp.float32)
    rmean = 0.1 * jax.random.normal(ks[6], (nb, 1, dim), jnp.float32)
    rvar = 0.5 + jnp.abs(jax.random.normal(ks[7], (nb, 1, dim), jnp.float32))
    bn_scale = gamma / jnp.sqrt(rvar + BN_EPS)
    bn_shift = beta - rmean * bn_scale
    return dict(w_conv=w_conv, b_conv=b_conv, w_blk=w_blk, b_blk=b_blk,
                bn_scale=bn_scale, bn_shift=bn_shift)


# ------------------------------ pure-JAX reference -----------------------------
def reference_forward(params, x):
    dim = CFG["model_hidden"]
    B, _, L = x.shape
    L_conv = (L + 2 * PAD - KSIZE) // STRIDE + 1
    xp = jnp.pad(x, ((0, 0), (0, 0), (PAD, PAD)))
    conv = sum(jnp.einsum("bcl,oc->bol", xp[:, :, k:k + L_conv], params["w_conv"][:, :, k])
               for k in range(KSIZE)) + params["b_conv"][None, :, None]
    conv = jnp.maximum(conv, 0.0)
    L_out = (L_conv - POOL_K) // POOL_S + 1
    pooled = jnp.stack(
        [conv[:, :, POOL_S * j:POOL_S * j + POOL_K].max(axis=-1) for j in range(L_out)],
        axis=-1)                                              # (B, dim, L_out)
    h = pooled.reshape(-1, dim)
    for i in range(CFG["model_nblocks"]):
        h = h @ params["w_blk"][i] + params["b_blk"][i, 0]
        h = h * params["bn_scale"][i, 0] + params["bn_shift"][i, 0]
        h = jnp.maximum(h, 0.0)
    return h


if __name__ == "__main__":
    key = jax.random.PRNGKey(0)
    kp, kx = jax.random.split(key)
    params = init_params(kp)

    B, L = 2, 16
    x = jax.random.normal(kx, (B, CFG["window_size"], L), jnp.float32)  # (batch, window_size, length)

    fwd = jax.jit(cnn_forward)
    out = jax.block_until_ready(fwd(params, x))

    L_conv = (L + 2 * PAD - KSIZE) // STRIDE + 1
    L_out = (L_conv - POOL_K) // POOL_S + 1
    assert out.shape == (B * L_out, CFG["model_hidden"]), out.shape

    ref = reference_forward(params, x)
    if not jnp.allclose(out, ref, rtol=1e-2, atol=1e-2):
        raise AssertionError("Pallas kernel output mismatch vs reference")

    print("KERNEL_OK")
</pallas_src>

<mosaic_0001>
module attributes {stable_mosaic.version = 11 : i64} {
  func.func @_conv_block_kernel(%arg0: i32, %arg1: memref<3x4x32xf32, #tpu.memory_space<vmem>>, %arg2: memref<1x32xf32, #tpu.memory_space<vmem>>, %arg3: memref<1x18x4xf32, #tpu.memory_space<vmem>>, %arg4: memref<1x7x32xf32, #tpu.memory_space<vmem>>) attributes {dimension_semantics = [#tpu.dimension_semantics<parallel>], iteration_bounds = array<i64: 2>, scalar_prefetch = 0 : i64, scratch_operands = 0 : i64, tpu.core_type = #tpu.core_type<tc>, window_params = [{pipeline_mode = #tpu.pipeline_mode<synchronous>, transform_indices = @transform_0, window_bounds = array<i64: 3, 4, 32>}, {pipeline_mode = #tpu.pipeline_mode<synchronous>, transform_indices = @transform_1, window_bounds = array<i64: 1, 32>}, {transform_indices = @transform_2, window_bounds = array<i64: 1, 18, 4>}, {transform_indices = @transform_3, window_bounds = array<i64: 1, 7, 32>}]} {
    %c0 = arith.constant 0 : index
    %c0_0 = arith.constant 0 : index
    %c0_1 = arith.constant 0 : index
    %0 = vector.load %arg3[%c0, %c0_0, %c0_1] : memref<1x18x4xf32, #tpu.memory_space<vmem>>, vector<1x18x4xf32>
    %1 = vector.shape_cast %0 : vector<1x18x4xf32> to vector<18x4xf32>
    %2 = vector.extract_strided_slice %1 {offsets = [0, 0], sizes = [16, 4], strides = [1, 1]} : vector<18x4xf32> to vector<16x4xf32>
    %c0_2 = arith.constant 0 : index
    %c0_3 = arith.constant 0 : index
    %c0_4 = arith.constant 0 : index
    %3 = vector.load %arg1[%c0_2, %c0_3, %c0_4] : memref<3x4x32xf32, #tpu.memory_space<vmem>>, vector<1x4x32xf32>
    %4 = vector.shape_cast %3 : vector<1x4x32xf32> to vector<4x32xf32>
    %cst = arith.constant dense<0.000000e+00> : vector<16x32xf32>
    %5 = tpu.matmul %2, %4, %cst {dimension_numbers = #tpu.dot_dimension_numbers<[1], [0], [0], [1], [0, 0, 1, 1], [], []>} : vector<16x4xf32>, vector<4x32xf32>, vector<16x32xf32> -> vector<16x32xf32>
    %6 = vector.extract_strided_slice %1 {offsets = [1, 0], sizes = [16, 4], strides = [1, 1]} : vector<18x4xf32> to vector<16x4xf32>
    %c1 = arith.constant 1 : index
    %c0_5 = arith.constant 0 : index
    %c0_6 = arith.constant 0 : index
    %7 = vector.load %arg1[%c1, %c0_5, %c0_6] : memref<3x4x32xf32, #tpu.memory_space<vmem>>, vector<1x4x32xf32>
    %8 = vector.shape_cast %7 : vector<1x4x32xf32> to vector<4x32xf32>
    %cst_7 = arith.constant dense<0.000000e+00> : vector<16x32xf32>
    %9 = tpu.matmul %6, %8, %cst_7 {dimension_numbers = #tpu.dot_dimension_numbers<[1], [0], [0], [1], [0, 0, 1, 1], [], []>} : vector<16x4xf32>, vector<4x32xf32>, vector<16x32xf32> -> vector<16x32xf32>
    %10 = arith.addf %5, %9 : vector<16x32xf32>
    %11 = vector.extract_strided_slice %1 {offsets = [2, 0], sizes = [16, 4], strides = [1, 1]} : vector<18x4xf32> to vector<16x4xf32>
    %c2 = arith.constant 2 : index
    %c0_8 = arith.constant 0 : index
    %c0_9 = arith.constant 0 : index
    %12 = vector.load %arg1[%c2, %c0_8, %c0_9] : memref<3x4x32xf32, #tpu.memory_space<vmem>>, vector<1x4x32xf32>
    %13 = vector.shape_cast %12 : vector<1x4x32xf32> to vector<4x32xf32>
    %cst_10 = arith.constant dense<0.000000e+00> : vector<16x32xf32>
    %14 = tpu.matmul %11, %13, %cst_10 {dimension_numbers = #tpu.dot_dimension_numbers<[1], [0], [0], [1], [0, 0, 1, 1], [], []>} : vector<16x4xf32>, vector<4x32xf32>, vector<16x32xf32> -> vector<16x32xf32>
    %15 = arith.addf %10, %14 : vector<16x32xf32>
    %c0_11 = arith.constant 0 : index
    %c0_12 = arith.constant 0 : index
    %16 = vector.load %arg2[%c0_11, %c0_12] : memref<1x32xf32, #tpu.memory_space<vmem>>, vector<1x32xf32>
    %17 = vector.broadcast %16 : vector<1x32xf32> to vector<16x32xf32>
    %18 = arith.addf %15, %17 : vector<16x32xf32>
    %cst_13 = arith.constant 0.000000e+00 : f32
    %19 = vector.broadcast %cst_13 : f32 to vector<16x32xf32>
    %20 = arith.maximumf %18, %19 : vector<16x32xf32>
    %21 = vector.extract_strided_slice %20 {offsets = [0, 0], sizes = [3, 32], strides = [1, 1]} : vector<16x32xf32> to vector<3x32xf32>
    %cst_14 = arith.constant dense<0xFF800000> : vector<32xf32>
    %22 = vector.multi_reduction <maximumf>, %21, %cst_14 [0] : vector<3x32xf32> to vector<32xf32>
    %23 = vector.shape_cast %22 : vector<32xf32> to vector<1x32xf32>
    %24 = vector.extract_strided_slice %20 {offsets = [2, 0], sizes = [3, 32], strides = [1, 1]} : vector<16x32xf32> to vector<3x32xf32>
    %cst_15 = arith.constant dense<0xFF800000> : vector<32xf32>
    %25 = vector.multi_reduction <maximumf>, %24, %cst_15 [0] : vector<3x32xf32> to vector<32xf32>
    %26 = vector.shape_cast %25 : vector<32xf32> to vector<1x32xf32>
    %27 = vector.extract_strided_slice %20 {offsets = [4, 0], sizes = [3, 32], strides = [1, 1]} : vector<16x32xf32> to vector<3x32xf32>
    %cst_16 = arith.constant dense<0xFF800000> : vector<32xf32>
    %28 = vector.multi_reduction <maximumf>, %27, %cst_16 [0] : vector<3x32xf32> to vector<32xf32>
    %29 = vector.shape_cast %28 : vector<32xf32> to vector<1x32xf32>
    %30 = vector.extract_strided_slice %20 {offsets = [6, 0], sizes = [3, 32], strides = [1, 1]} : vector<16x32xf32> to vector<3x32xf32>
    %cst_17 = arith.constant dense<0xFF800000> : vector<32xf32>
    %31 = vector.multi_reduction <maximumf>, %30, %cst_17 [0] : vector<3x32xf32> to vector<32xf32>
    %32 = vector.shape_cast %31 : vector<32xf32> to vector<1x32xf32>
    %33 = vector.extract_strided_slice %20 {offsets = [8, 0], sizes = [3, 32], strides = [1, 1]} : vector<16x32xf32> to vector<3x32xf32>
    %cst_18 = arith.constant dense<0xFF800000> : vector<32xf32>
    %34 = vector.multi_reduction <maximumf>, %33, %cst_18 [0] : vector<3x32xf32> to vector<32xf32>
    %35 = vector.shape_cast %34 : vector<32xf32> to vector<1x32xf32>
    %36 = vector.extract_strided_slice %20 {offsets = [10, 0], sizes = [3, 32], strides = [1, 1]} : vector<16x32xf32> to vector<3x32xf32>
    %cst_19 = arith.constant dense<0xFF800000> : vector<32xf32>
    %37 = vector.multi_reduction <maximumf>, %36, %cst_19 [0] : vector<3x32xf32> to vector<32xf32>
    %38 = vector.shape_cast %37 : vector<32xf32> to vector<1x32xf32>
    %39 = vector.extract_strided_slice %20 {offsets = [12, 0], sizes = [3, 32], strides = [1, 1]} : vector<16x32xf32> to vector<3x32xf32>
    %cst_20 = arith.constant dense<0xFF800000> : vector<32xf32>
    %40 = vector.multi_reduction <maximumf>, %39, %cst_20 [0] : vector<3x32xf32> to vector<32xf32>
    %41 = vector.shape_cast %40 : vector<32xf32> to vector<1x32xf32>
    %42 = tpu.concatenate %23, %26, %29, %32, %35, %38, %41 in 0 : vector<1x32xf32>, vector<1x32xf32>, vector<1x32xf32>, vector<1x32xf32>, vector<1x32xf32>, vector<1x32xf32>, vector<1x32xf32> -> vector<7x32xf32>
    %c0_21 = arith.constant 0 : index
    %c0_22 = arith.constant 0 : index
    %c0_23 = arith.constant 0 : index
    %43 = vector.load %arg4[%c0_21, %c0_22, %c0_23] : memref<1x7x32xf32, #tpu.memory_space<vmem>>, vector<1x7x32xf32>
    %44 = vector.shape_cast %43 : vector<1x7x32xf32> to vector<7x32xf32>
    %45 = vector.shape_cast %42 : vector<7x32xf32> to vector<1x7x32xf32>
    tpu.vector_store %arg4[%c0_21, %c0_22, %c0_23], %45 {strides = array<i32>} : memref<1x7x32xf32, #tpu.memory_space<vmem>>, vector<1x7x32xf32>,
    return
  }
  func.func @transform_0(%arg0: i32) -> (i32, i32, i32) {
    %c0_i32 = arith.constant 0 : i32
    %c0_i32_0 = arith.constant 0 : i32
    %c0_i32_1 = arith.constant 0 : i32
    %c0_i32_2 = arith.constant 0 : i32
    return %c0_i32, %c0_i32_0, %c0_i32_1 : i32, i32, i32
  }
  func.func @transform_1(%arg0: i32) -> (i32, i32) {
    %c0_i32 = arith.constant 0 : i32
    %c0_i32_0 = arith.constant 0 : i32
    %c0_i32_1 = arith.constant 0 : i32
    return %c0_i32, %c0_i32_0 : i32, i32
  }
  func.func @transform_2(%arg0: i32) -> (i32, i32, i32) {
    %c0_i32 = arith.constant 0 : i32
    %c0_i32_0 = arith.constant 0 : i32
    %c0_i32_1 = arith.constant 0 : i32
    return %arg0, %c0_i32, %c0_i32_0 : i32, i32, i32
  }
  func.func @transform_3(%arg0: i32) -> (i32, i32, i32) {
    %c0_i32 = arith.constant 0 : i32
    %c0_i32_0 = arith.constant 0 : i32
    %c0_i32_1 = arith.constant 0 : i32
    return %arg0, %c0_i32, %c0_i32_0 : i32, i32, i32
  }
}

module attributes {stable_mosaic.version = 11 : i64} {
  func.func @_mlp_kernel(%arg0: i32, %arg1: memref<14x32xf32, #tpu.memory_space<vmem>>, %arg2: memref<2x32x32xf32, #tpu.memory_space<vmem>>, %arg3: memref<2x1x32xf32, #tpu.memory_space<vmem>>, %arg4: memref<14x32xf32, #tpu.memory_space<vmem>>) attributes {dimension_semantics = [#tpu.dimension_semantics<parallel>], iteration_bounds = array<i64: 1>, scalar_prefetch = 0 : i64, scratch_operands = 0 : i64, tpu.core_type = #tpu.core_type<tc>, window_params = [{transform_indices = @transform_0, window_bounds = array<i64: 14, 32>}, {pipeline_mode = #tpu.pipeline_mode<synchronous>, transform_indices = @transform_1, window_bounds = array<i64: 2, 32, 32>}, {pipeline_mode = #tpu.pipeline_mode<synchronous>, transform_indices = @transform_2, window_bounds = array<i64: 2, 1, 32>}, {transform_indices = @transform_3, window_bounds = array<i64: 14, 32>}]} {
    %c0 = arith.constant 0 : index
    %c0_0 = arith.constant 0 : index
    %0 = vector.load %arg1[%c0, %c0_0] : memref<14x32xf32, #tpu.memory_space<vmem>>, vector<14x32xf32>
    %c0_1 = arith.constant 0 : index
    %c0_2 = arith.constant 0 : index
    %c0_3 = arith.constant 0 : index
    %1 = vector.load %arg2[%c0_1, %c0_2, %c0_3] : memref<2x32x32xf32, #tpu.memory_space<vmem>>, vector<1x32x32xf32>
    %2 = vector.shape_cast %1 : vector<1x32x32xf32> to vector<32x32xf32>
    %cst = arith.constant dense<0.000000e+00> : vector<14x32xf32>
    %3 = tpu.matmul %0, %2, %cst {dimension_numbers = #tpu.dot_dimension_numbers<[1], [0], [0], [1], [0, 0, 1, 1], [], []>} : vector<14x32xf32>, vector<32x32xf32>, vector<14x32xf32> -> vector<14x32xf32>
    %c0_4 = arith.constant 0 : index
    %c0_5 = arith.constant 0 : index
    %c0_6 = arith.constant 0 : index
    %4 = vector.load %arg3[%c0_4, %c0_5, %c0_6] : memref<2x1x32xf32, #tpu.memory_space<vmem>>, vector<1x1x32xf32>
    %5 = vector.shape_cast %4 : vector<1x1x32xf32> to vector<1x32xf32>
    %6 = vector.broadcast %5 : vector<1x32xf32> to vector<14x32xf32>
    %7 = arith.addf %3, %6 : vector<14x32xf32>
    %cst_7 = arith.constant 0.000000e+00 : f32
    %8 = vector.broadcast %cst_7 : f32 to vector<14x32xf32>
    %9 = arith.maximumf %7, %8 : vector<14x32xf32>
    %c1 = arith.constant 1 : index
    %c0_8 = arith.constant 0 : index
    %c0_9 = arith.constant 0 : index
    %10 = vector.load %arg2[%c1, %c0_8, %c0_9] : memref<2x32x32xf32, #tpu.memory_space<vmem>>, vector<1x32x32xf32>
    %11 = vector.shape_cast %10 : vector<1x32x32xf32> to vector<32x32xf32>
    %cst_10 = arith.constant dense<0.000000e+00> : vector<14x32xf32>
    %12 = tpu.matmul %9, %11, %cst_10 {dimension_numbers = #tpu.dot_dimension_numbers<[1], [0], [0], [1], [0, 0, 1, 1], [], []>} : vector<14x32xf32>, vector<32x32xf32>, vector<14x32xf32> -> vector<14x32xf32>
    %c1_11 = arith.constant 1 : index
    %c0_12 = arith.constant 0 : index
    %c0_13 = arith.constant 0 : index
    %13 = vector.load %arg3[%c1_11, %c0_12, %c0_13] : memref<2x1x32xf32, #tpu.memory_space<vmem>>, vector<1x1x32xf32>
    %14 = vector.shape_cast %13 : vector<1x1x32xf32> to vector<1x32xf32>
    %15 = vector.broadcast %14 : vector<1x32xf32> to vector<14x32xf32>
    %16 = arith.addf %12, %15 : vector<14x32xf32>
    %cst_14 = arith.constant 0.000000e+00 : f32
    %17 = vector.broadcast %cst_14 : f32 to vector<14x32xf32>
    %18 = arith.maximumf %16, %17 : vector<14x32xf32>
    %c0_15 = arith.constant 0 : index
    %c0_16 = arith.constant 0 : index
    %19 = vector.load %arg4[%c0_15, %c0_16] : memref<14x32xf32, #tpu.memory_space<vmem>>, vector<14x32xf32>
    tpu.vector_store %arg4[%c0_15, %c0_16], %18 {strides = array<i32>} : memref<14x32xf32, #tpu.memory_space<vmem>>, vector<14x32xf32>,
    return
  }
  func.func @transform_0(%arg0: i32) -> (i32, i32) {
    %c0_i32 = arith.constant 0 : i32
    %c0_i32_0 = arith.constant 0 : i32
    return %arg0, %c0_i32 : i32, i32
  }
  func.func @transform_1(%arg0: i32) -> (i32, i32, i32) {
    %c0_i32 = arith.constant 0 : i32
    %c0_i32_0 = arith.constant 0 : i32
    %c0_i32_1 = arith.constant 0 : i32
    %c0_i32_2 = arith.constant 0 : i32
    return %c0_i32, %c0_i32_0, %c0_i32_1 : i32, i32, i32
  }
  func.func @transform_2(%arg0: i32) -> (i32, i32, i32) {
    %c0_i32 = arith.constant 0 : i32
    %c0_i32_0 = arith.constant 0 : i32
    %c0_i32_1 = arith.constant 0 : i32
    %c0_i32_2 = arith.constant 0 : i32
    return %c0_i32, %c0_i32_0, %c0_i32_1 : i32, i32, i32
  }
  func.func @transform_3(%arg0: i32) -> (i32, i32) {
    %c0_i32 = arith.constant 0 : i32
    %c0_i32_0 = arith.constant 0 : i32
    return %arg0, %c0_i32 : i32, i32
  }
}

</mosaic_0001>

<bundles_post_ra>
// kernel: cnn_forward.2
= control target key start
LH: loop header
LB: loop body
LE: loop exit
PB: predicated region body
PF: predicated region fallthrough
CT: control target
= control target key end

     0   :  { %s660_s12 = smov 0   ;;  %s713_s0 = inlined_call_operand.vmem [shape: f32[3,4,32], index: 0, kind: input, shape index: {}]   ;;  %s714_s1 = inlined_call_operand.vmem [shape: f32[1,32], index: 1, kind: input, shape index: {}]   ;;  %s715_s2 = inlined_call_operand.vmem [shape: f32[2,18,4], index: 2, kind: input, shape index: {}]   ;;  %s716_s3 = inlined_call_operand.vmem [shape: f32[2,7,32], index: 3, kind: output, shape index: {}]  }
   0x1 LB: > { %s574_s13 = sadd.s32 4294967295, %s638_s12   ;;  %p578_p0 = scmp.ge.s32.totalorder %s638_s12, 1  ;;  %s638_s12 = sphi %s660_s12, %s13_s12  }
   0x2   : > { %p137_p1 = scmp.lt.s32.totalorder %s638_s12, 3 }
   0x4   : > { %p138_p2 = pnand %p578_p0, %p137_p1 }
   0x5   : > { %v172_v0 = vld [vmem:[%s713_s0] sm:$0xf] (!%p138_p2)  ;;  %vm189_vm0 = vcmask (!%p138_p2), 1043456   ;;  %p160_p3 = scmp.lt.s32.totalorder (!%p138_p2), %s574_s13, 1  ;;  %v588_v1 = vld [vmem:[%s713_s0 + $0x8] sm:$0xf] (!%p138_p2) }
   0x6   : > { %141 = sbr.rel (%p138_p2) target bundleno = 268 (0x10c), region = 32  ;;  %609 = vmatprep.subr.msk.mxu0 (!%p138_p2), %vm189_vm0, %v172_v0  ;;  %v581_v2 = vld [vmem:[%s713_s0 + $0x4] sm:$0xf] (!%p138_p2)  ;;  %vm184_vm1 = vcmask (!%p138_p2), 31744   ;;  %vm178_vm2 = vcmask (!%p138_p2), 1046528   ;;  %vm352_vm3 = vcmask (!%p138_p2), 1045504  }
   0x7   : > { %610 = vmatpush3.msk.msra.mxu0 (!%p138_p2), %vm189_vm0, %v172_v0  ;;  %604 = vmatprep.subr.msk.mxu1 (!%p138_p2), %vm189_vm0, %v581_v2  ;;  %v592_v19 = vld [vmem:[%s714_s1] ss:$0 sm:$0xff] (!%p138_p2)  ;;  %vm453_vm4 = vcmask (!%p138_p2), 256000   ;;  %vm461_vm5 = vcmask (!%p138_p2), 258050   ;;  %vm469_vm6 = vcmask (!%p138_p2), 260100   ;;  %vm479_vm7 = vcmask (!%p138_p2), 253952  }
   0x8   : > { %614 = vmatprep.subr.msk.mxu0 (!%p138_p2), %vm189_vm0, %v588_v1  ;;  %605 = vmatpush3.msk.msra.mxu1 (!%p138_p2), %vm189_vm0, %v581_v2  ;;  %vm477_vm8 = vcmask (!%p138_p2), 261126   ;;  %vm509_vm9 = vcmask (!%p138_p2), 1040384   ;;  %vm511_vm10 = vcmask (!%p138_p2), 1041408   ;;  %vm513_vm11 = vcmask (!%p138_p2), 1042432  }
   0x9   : > { %vm516_vm12 = vcmask (!%p138_p2), 1044480   ;;  %vm519_vm13 = vcmask (!%p138_p2), 260096  }
   0xd   : > { %s718_s13 = smov (!%p160_p3, %s574_s13), 1 }
   0xe   : > { %s623_s20 = smul.u32 24, %s718_s13  ;;  %s580_s26 = sshll.u32 %s718_s13, 3 }
   0xf   : > { %s168_s29 = scalar_lea.vmem %s716_s3, %s580_s26 }
  0x10   : > { %s164_s23 = scalar_lea.vmem %s715_s2, %s623_s20 }
  0x11   : > { %v169_v3 = vld [vmem:[%s164_s23] sm:$0xff]  ;;  %v171_v4 = vld [vmem:[%s164_s23 + $0x10] sm:$0x3]  ;;  %v170_v5 = vld [vmem:[%s164_s23 + $0x8] sm:$0xff] }
  0x12   : > { %v179_v6 = vrot.slane %v169_v3, 1  ;;  %v182_v7 = vrot.slane %v171_v4, 1  ;;  %611 = vmatprep.mubr.msk.f32.mxu0 %vm184_vm1, %v169_v3  ;;  %v353_v8 = vrot.slane %v169_v3, 2  ;;  %v354_v9 = vrot.slane %v170_v5, 2 }
  0x13   : > { %612 = vmatmul.mubr.msk.f32.vlgmr.msra.gmra.mrb[0].mxu0 %vm184_vm1, %v170_v5  ;;  %v180_v10 = vrot.slane %v170_v5, 1  ;;  %v356_v11 = vrot.slane %v171_v4, 2 }
  0x14   : > { %615 = vmatpush3.msk.msra.mxu0 %vm189_vm0, %v588_v1  ;;  %v355_v14 = vsel %vm352_vm3, %v353_v8, %v354_v9 }
  0x15   : > { %v181_v12 = vsel %vm178_vm2, %v179_v6, %v180_v10  ;;  %v183_v13 = vsel %vm178_vm2, %v180_v10, %v182_v7  ;;  %616 = vmatprep.mubr.msk.f32.mxu0 %vm184_vm1, %v355_v14  ;;  %v357_v15 = vsel %vm352_vm3, %v354_v9, %v356_v11 }
  0x16   : > { %606 = vmatprep.mubr.msk.f32.mxu1 %vm184_vm1, %v181_v12 }
  0x17   : > { %607 = vmatmul.mubr.msk.f32.vlgmr.msra.gmra.mrb[0].mxu1 %vm184_vm1, %v183_v13 }
  0x1b   : > { %617 = vmatmul.mubr.msk.f32.vlgmr.msra.gmra.mrb[0].mxu0 %vm184_vm1, %v357_v15 }
  0xea   : > { %v608_v16 = vpop.f32.mrb[0].mxu1 }
  0xeb   : > { %v259_v17 = vpop.f32.mrb[1].mxu1 }
  0xee   : > { %v618_v18 = vpop.f32.mrb[0].mxu0 }
  0xef   : > { %v619_v20 = vadd.f32 %v618_v18, %v608_v16  ;;  %v431_v21 = vpop.f32.mrb[1].mxu0 }
  0xf0   : > { %v620_v22 = vadd.f32 %v431_v21, %v259_v17 }
  0xf1   : > { %v450_v23 = vadd.f32 %v619_v20, %v592_v19 }
  0xf2   : > { %v449_v24 = vadd.f32 %v620_v22, %v592_v19 }
  0xf3   : > { %v452_v25 = vmax.f32 %v450_v23, 0.0 }
  0xf4   : > { %v451_v26 = vmax.f32 %v449_v24, 0.0 }
  0xf5   : > { %v480_v27 = vsel %vm479_vm7, %v452_v25, -inf  ;;  %v488_v28 = vsel %vm453_vm4, %v452_v25, -inf  ;;  %v495_v29 = vsel %vm461_vm5, %v452_v25, -inf  ;;  %v502_v30 = vsel %vm469_vm6, %v452_v25, -inf }
  0xf6   : > { %v489_v31 = vrot.slane %v488_v28, 4  ;;  %v496_v32 = vrot.slane %v495_v29, 4  ;;  %v503_v33 = vrot.slane %v502_v30, 4  ;;  %v454_v34 = vsel %vm453_vm4, %v451_v26, -inf }
  0xf7   : > { %v455_v35 = vrot.slane %v454_v34, 4  ;;  %v462_v36 = vsel %vm461_vm5, %v451_v26, -inf  ;;  %v470_v37 = vsel %vm469_vm6, %v451_v26, -inf  ;;  %v478_v38 = vsel %vm477_vm8, %v451_v26, -inf }
  0xf8   : > { %v490_v39 = vmax.f32 %v488_v28, %v489_v31  ;;  %v497_v40 = vmax.f32 %v495_v29, %v496_v32  ;;  %v504_v41 = vmax.f32 %v502_v30, %v503_v33  ;;  %v463_v42 = vrot.slane %v462_v36, 4 }
  0xf9   : > { %v456_v43 = vmax.f32 %v454_v34, %v455_v35  ;;  %v471_v44 = vrot.slane %v470_v37, 4  ;;  %v481_v45 = vmax.f32 %v478_v38, %v480_v27 }
  0xfa   : > { %v491_v46 = vrot.slane %v490_v39, 2  ;;  %v464_v47 = vmax.f32 %v462_v36, %v463_v42  ;;  %v498_v48 = vrot.slane %v497_v40, 2  ;;  %v505_v52 = vrot.slane %v504_v41, 2 }
  0xfb   : > { %v457_v49 = vrot.slane %v456_v43, 2  ;;  %v472_v50 = vmax.f32 %v470_v37, %v471_v44  ;;  %v482_v51 = vrot.slane %v481_v45, 4 }
  0xfc   : > { %v465_v53 = vrot.slane %v464_v47, 2  ;;  %v492_v57 = vmax.f32 %v490_v39, %v491_v46  ;;  %v499_v59 = vmax.f32 %v497_v40, %v498_v48  ;;  %v506_v63 = vmax.f32 %v504_v41, %v505_v52 }
  0xfd   : > { %v458_v54 = vmax.f32 %v456_v43, %v457_v49  ;;  %v473_v55 = vrot.slane %v472_v50, 2  ;;  %v483_v56 = vmax.f32 %v481_v45, %v482_v51 }
  0xfe   : > { %v466_v58 = vmax.f32 %v464_v47, %v465_v53  ;;  %v493_v4 = vrot.slane %v492_v57, 1  ;;  %v500_v6 = vrot.slane %v499_v59, 1  ;;  %v507_v9 = vrot.slane %v506_v63, 1 }
  0xff   : > { %v459_v60 = vrot.slane %v458_v54, 1  ;;  %v474_v61 = vmax.f32 %v472_v50, %v473_v55  ;;  %v484_v62 = vrot.slane %v483_v56, 2 }
 0x100   : > { %v467_v0 = vrot.slane %v466_v58, 1  ;;  %v494_v13 = vmax.f32 %v492_v57, %v493_v4  ;;  %v501_v14 = vmax.f32 %v499_v59, %v500_v6  ;;  %v508_v16 = vmax.f32 %v506_v63, %v507_v9 }
 0x101   : > { %v460_v1 = vmax.f32 %v458_v54, %v459_v60  ;;  %v475_v2 = vrot.slane %v474_v61, 1  ;;  %v485_v3 = vmax.f32 %v483_v56, %v484_v62 }
 0x102   : > { %v468_v5 = vmax.f32 %v466_v58, %v467_v0 }
 0x103   : > { %v476_v7 = vmax.f32 %v474_v61, %v475_v2  ;;  %v486_v8 = vrot.slane %v485_v3, 1 }
 0x104   : > { %v510_v10 = vsel %vm509_vm9, %v460_v1, %v468_v5 }
 0x105   : > { %v487_v11 = vmax.f32 %v485_v3, %v486_v8  ;;  %v512_v12 = vsel %vm511_vm10, %v510_v10, %v476_v7 }
 0x107   : > { %v514_v15 = vsel %vm513_vm11, %v512_v12, %v487_v11 }
 0x108   : > { %v515_v17 = vsel %vm189_vm0, %v514_v15, %v494_v13 }
 0x109   : > { %v517_v18 = vsel %vm516_vm12, %v515_v17, %v501_v14 }
 0x10a   : > { %v518_v19 = vsel %vm352_vm3, %v517_v18, %v508_v16 }
 0x10b   : > { %520 = vst.msk [vmem:[%s168_s29] sm:$0x7f] %vm519_vm13, %v518_v19 }
 0x10c PF: > { %s13_s12 = sadd.s32 1, %s638_s12  }
 0x10d   : > { %p10_p4 = scmp.ge.s32.totalorder %s13_s12, 4  }
 0x10f   :  { %12 = sbr.rel (!%p10_p4) target bundleno = 1 (0x1), region = 64 }

// kernel: cnn_forward.3
= control target key start
LH: loop header
LB: loop body
LE: loop exit
PB: predicated region body
PF: predicated region fallthrough
CT: control target
= control target key end

     0   :  { %vm28_vm0 = vcmask 261120   ;;  %s391_s0 = inlined_call_operand.vmem [shape: f32[14,32], index: 0, kind: input, shape index: {}]   ;;  %s392_s1 = inlined_call_operand.vmem [shape: f32[2,32,32], index: 1, kind: input, shape index: {}]   ;;  %s393_s2 = inlined_call_operand.vmem [shape: f32[2,1,32], index: 2, kind: input, shape index: {}]   ;;  %s394_s3 = inlined_call_operand.hbm [shape: f32[14,32], index: 3, kind: output, shape index: {}]  }
   0x1   :  { %v17_v0 = vld [vmem:[%s392_s1] sm:$0xff]  ;;  %v18_v1 = vld [vmem:[%s392_s1 + $0x8] sm:$0xff]  ;;  %v19_v2 = vld [vmem:[%s392_s1 + $0x10] sm:$0xff] }
   0x2   :  { %v272_v3 = vpack.c.bf16 %v18_v1, %v17_v0  ;;  %v20_v4 = vld [vmem:[%s392_s1 + $0x18] sm:$0xff]  ;;  %v15_v5 = vld [vmem:[%s391_s0] sm:$0xff]  ;;  %v231_v8 = vld [vmem:[%s392_s1 + $0x28] sm:$0xff] }
   0x3   :  { %v276_v6 = vpack.c.bf16 %v20_v4, %v19_v2  ;;  %258 = vmatprep.mubr.msk.f32.mxu0 %vm28_vm0, %v15_v5  ;;  %v230_v7 = vld [vmem:[%s392_s1 + $0x20] sm:$0xff] }
   0x4   :  { %8 = vsyncpa [#allocation3], 0  ;;  %273 = vmatprep.subr.bf16.mxu0 %v272_v3  ;;  %v280_v9 = vpack.c.bf16 %v231_v8, %v230_v7  ;;  %v16_v10 = vld [vmem:[%s391_s0 + $0x8] sm:$0x3f]  ;;  %v232_v11 = vld [vmem:[%s392_s1 + $0x30] sm:$0xff]  ;;  %vm209_vm1 = vcmask 259072  }
   0x5   :  { %275 = vmatpush3.bf16.msra.mxu0 %v272_v3  ;;  %v233_v12 = vld [vmem:[%s392_s1 + $0x38] sm:$0xff]  ;;  %v227_v14 = vld [vmem:[%s393_s2] ss:$0 sm:$0xff]  ;;  %v235_v21 = vld [vmem:[%s393_s2 + $0x1] ss:$0 sm:$0xff]  ;;  %s315_s1 = smov [#allocation2]  }
   0x6   :  { %277 = vmatprep.subr.bf16.mxu0 %v276_v6  ;;  %281 = vmatprep.subr.bf16.mxu1 %v280_v9  ;;  %v284_v13 = vpack.c.bf16 %v233_v12, %v232_v11  ;;  %s216_s8 = sshll.u32 %s315_s1, 4  ;;  %s217_s8 = int_to_ptr.vmem [resolvable:$true] %s216_s8 }
   0x7   :  { %283 = vmatpush3.bf16.msra.mxu1 %v280_v9  ;;  %s291_s9 = scalar_lea.vmem %s217_s8, 256  ;;  %p296_p1 = scmp.lt.s32.totalorder %s217_s8, %s217_s8 }
   0x8   :  { %285 = vmatprep.subr.bf16.mxu1 %v284_v13  ;;  %p292_p0 = scmp.ne.s32.totalorder %s217_s8, %s291_s9  ;;  %p297_p2 = scmp.lt.s32.totalorder %s291_s9, %s291_s9 }
   0x9   :  { %279 = vmatpush3.bf16.msra.mxu0 %v276_v6 }
   0xa   :  { %p298_p3 = por %p297_p2, %p296_p1 }
   0xb   :  { %287 = vmatpush3.bf16.msra.mxu1 %v284_v13 }
   0xc   :  { %259 = vmatmul.mubr.msk.f32.vlgmr.msra.gmra.mrb[0].mxu0 %vm28_vm0, %v16_v10  ;;  %p299_p4 = pnand %p298_p3, %p292_p0 }
  0xdf   :  { %v260_v15 = vpop.f32.mrb[0].mxu0 }
  0xe0   :  { %v107_v16 = vadd.f32 %v260_v15, %v227_v14  ;;  %v101_v17 = vpop.f32.mrb[1].mxu0 }
  0xe1   :  { %v102_v18 = vadd.f32 %v227_v14, %v101_v17 }
  0xe2   :  { %v111_v20 = vmax.f32 %v107_v16, 0.0 }
  0xe3   :  { %v110_v19 = vmax.f32 %v102_v18, 0.0 }
  0xe5   :  { %269 = vmatprep.mubr.msk.f32.mxu1 %vm28_vm0, %v110_v19 }
  0xe6   :  { %270 = vmatmul.mubr.msk.f32.vlgmr.msra.gmra.mrb[0].mxu1 %vm28_vm0, %v111_v20 }
 0x1b9   :  { %v271_v22 = vpop.f32.mrb[0].mxu1 }
 0x1ba   :  { %v203_v23 = vadd.f32 %v271_v22, %v235_v21  ;;  %v197_v24 = vpop.f32.mrb[1].mxu1 }
 0x1bb   :  { %v198_v25 = vadd.f32 %v235_v21, %v197_v24 }
 0x1bc   :  { %v207_v26 = vmax.f32 %v203_v23, 0.0 }
 0x1bd   :  { %v206_v27 = vmax.f32 %v198_v25, 0.0 }
 0x1be   :  { %210 = vst.msk [vmem:[#allocation2 + $0x8] sm:$0x3f] %vm209_vm1, %v207_v26 }
 0x1bf   :  { %208 = vst.msk [vmem:[#allocation2] sm:$0xff] %vm28_vm0, %v206_v27 }
 0x1c0   :  { %302 = shalt.err (!%p299_p4)
}
 0x1c1   :  { %s303_s11 = scalar_lea.hbm %s394_s3, 256 }
 0x1c2   :  { %p304_p5 = scmp.ne.s32.totalorder %s394_s3, %s303_s11  ;;  %p307_p6 = scmp.lt.u32.totalorder %s303_s11, %s394_s3 }
 0x1c4   :  { %p309_p7 = pnand %p307_p6, %p304_p5 }
 0x1c6   :  { %312 = shalt.err (!%p309_p7)
}
 0x1c7   :  { %s316_s16 = smov 128   ;;  %s317_s17 = smov 8  }
 0x1c8   :  { %222 = dma.vmem_to_hbm [thread:$0]  %s217_s8, 256, %s394_s3, [#allocation3], %s316_s16, %s316_s16, %s317_s17  }
 0x1c9   :  { %313 = dma.done.wait [#allocation3], 256  }
 0x1ca   :  { %314 = vsyncadd [#allocation3], 4294967040 }
 0x1cb   :  { %226 = vsyncpa [#allocation3], 1 }

</bundles_post_ra>
